<compile_context>
chip_gen: v7x
topology: tpu7x:2x2x1
jax: 0.10.0
libtpu: 0.0.40
codegen_flags: <defaults>
</compile_context>

<pallas_src>
import jax
import jax.numpy as jnp
from jax.experimental import pallas as pl
from jax.experimental.pallas import tpu as pltpu


def _linear_mlp_kernel(x_ref, w_ref, o_ref):
    # x_ref: (tm, n_in)      -- tile of rows for one ensemble member
    # w_ref: (n_in, n_pad)   -- full pre-transposed, lane-padded weight
    # o_ref: (tm, n_pad)
    o_ref[...] = jnp.dot(
        x_ref[...], w_ref[...], preferred_element_type=jnp.float32
    ).astype(o_ref.dtype)


def _round_up(v, m):
    return ((v + m - 1) // m) * m


def linear_mlp_block(x, W, *, tm=None):
    """x: (N_net, d, n_t, n_in), W: (N_net, n, n_in) -> (N_net, d, n_t, n)."""
    N_net, d, n_t, n_in = x.shape
    N_net_w, n, n_in_w = W.shape
    assert N_net == N_net_w and n_in == n_in_w

    dtype = x.dtype
    dtype_bytes = jnp.dtype(dtype).itemsize

    # ---- one-time layout prep (plain XLA ops) -----------------------------
    M = d * n_t
    x2 = x.reshape(N_net, M, n_in)

    # Pre-transpose W to (N_net, n_in, n): natural MXU weight layout.
    Wt = jnp.swapaxes(W, 1, 2)

    # Pad output feature dim to a multiple of 128 -> lane-dense stores.
    n_pad = _round_up(max(n, 128), 128)
    if n_pad != n:
        Wt = jnp.pad(Wt, ((0, 0), (0, 0), (0, n_pad - n)))

    # ---- row-tile selection ------------------------------------------------
    M8 = _round_up(M, 8)
    if tm is None:
        # Largest multiple of 8 up to 1024 rows, bounded by a ~12 MiB
        # double-buffered (x + out) budget so it also fits v7x (64 MiB VMEM).
        budget = 12 << 20
        bytes_per_row = 2 * (n_in + n_pad) * dtype_bytes  # double-buffered
        tm_cap = max(8, (budget // max(bytes_per_row, 1)) // 8 * 8)
        tm = min(M8, 1024, tm_cap)
        tm = max(8, (tm // 8) * 8)

    M_pad = _round_up(M8, tm)
    if M_pad != M:
        x2 = jnp.pad(x2, ((0, 0), (0, M_pad - M), (0, 0)))

    grid = (N_net, M_pad // tm)

    # VMEM budget: double-buffered x / out tiles + double-buffered W + slack.
    vmem_needed = (2 * tm * (n_in + n_pad) + 2 * n_in * n_pad) * dtype_bytes
    vmem_limit = int(min(max(2 * vmem_needed + (4 << 20), 16 << 20), 48 << 20))

    out2 = pl.pallas_call(
        _linear_mlp_kernel,
        out_shape=jax.ShapeDtypeStruct((N_net, M_pad, n_pad), dtype),
        grid_spec=pltpu.PrefetchScalarGridSpec(
            num_scalar_prefetch=0,
            grid=grid,
            in_specs=[
                pl.BlockSpec((pl.Squeezed(), tm, n_in), lambda N, i: (N, i, 0)),
                # Constant block index along the inner (row-tile) axis ->
                # Pallas skips redundant W DMAs; W stays resident per member.
                pl.BlockSpec((pl.Squeezed(), n_in, n_pad), lambda N, i: (N, 0, 0)),
            ],
            out_specs=pl.BlockSpec((pl.Squeezed(), tm, n_pad), lambda N, i: (N, i, 0)),
        ),
        compiler_params=pltpu.CompilerParams(
            dimension_semantics=("parallel", "parallel"),
            vmem_limit_bytes=vmem_limit,
        ),
    )(x2, Wt)

    return out2[:, :M, :n].reshape(N_net, d, n_t, n)


def init_weights(key, N_net, n, n_in, W_std=0.02, n_invariance_flag=False):
    if n_invariance_flag:
        W_std = W_std / jnp.sqrt(jnp.float32(n_in))
    return W_std * jax.random.normal(key, (N_net, n, n_in), dtype=jnp.float32)


if __name__ == "__main__":
    # Small shapes consistent with the module's forward:
    #   x: (N_net, d, n_t, n_in) = (2, 2, 8, 16), W: (N_net, n, n_in) = (2, 32, 16)
    N_net, d, n_t, n_in, n = 2, 2, 8, 16, 32

    key = jax.random.PRNGKey(0)
    k_w, k_x = jax.random.split(key)

    W = init_weights(k_w, N_net, n, n_in, W_std=0.02, n_invariance_flag=False)
    x = jax.random.normal(k_x, (N_net, d, n_t, n_in), dtype=jnp.float32)

    out = linear_mlp_block(x, W)
    out = jax.block_until_ready(out)

    # Reference check (plain JAX einsum, same as torch.einsum semantics).
    ref = jnp.einsum("Nji,Ndti->Ndtj", W, x)
    assert out.shape == (N_net, d, n_t, n)
    assert jnp.allclose(out, ref, atol=1e-5, rtol=1e-5)

    print("KERNEL_OK")
</pallas_src>

<mosaic_0001>
module attributes {stable_mosaic.version = 11 : i64} {
  func.func @_linear_mlp_kernel(%arg0: i32, %arg1: i32, %arg2: memref<1x16x16xf32, #tpu.memory_space<vmem>>, %arg3: memref<1x16x128xf32, #tpu.memory_space<vmem>>, %arg4: memref<1x16x128xf32, #tpu.memory_space<vmem>>) attributes {dimension_semantics = [#tpu.dimension_semantics<parallel>, #tpu.dimension_semantics<parallel>], iteration_bounds = array<i64: 2, 1>, scalar_prefetch = 0 : i64, scratch_operands = 0 : i64, tpu.core_type = #tpu.core_type<tc>, window_params = [{transform_indices = @transform_0, window_bounds = array<i64: 1, 16, 16>}, {transform_indices = @transform_1, window_bounds = array<i64: 1, 16, 128>}, {transform_indices = @transform_2, window_bounds = array<i64: 1, 16, 128>}]} {
    %c0 = arith.constant 0 : index
    %c0_0 = arith.constant 0 : index
    %c0_1 = arith.constant 0 : index
    %0 = vector.load %arg2[%c0, %c0_0, %c0_1] : memref<1x16x16xf32, #tpu.memory_space<vmem>>, vector<1x16x16xf32>
    %1 = vector.shape_cast %0 : vector<1x16x16xf32> to vector<16x16xf32>
    %c0_2 = arith.constant 0 : index
    %c0_3 = arith.constant 0 : index
    %c0_4 = arith.constant 0 : index
    %2 = vector.load %arg3[%c0_2, %c0_3, %c0_4] : memref<1x16x128xf32, #tpu.memory_space<vmem>>, vector<1x16x128xf32>
    %3 = vector.shape_cast %2 : vector<1x16x128xf32> to vector<16x128xf32>
    %cst = arith.constant dense<0.000000e+00> : vector<16x128xf32>
    %4 = tpu.matmul %1, %3, %cst {dimension_numbers = #tpu.dot_dimension_numbers<[1], [0], [0], [1], [0, 0, 1, 1], [], []>} : vector<16x16xf32>, vector<16x128xf32>, vector<16x128xf32> -> vector<16x128xf32>
    %c0_5 = arith.constant 0 : index
    %c0_6 = arith.constant 0 : index
    %c0_7 = arith.constant 0 : index
    %5 = vector.load %arg4[%c0_5, %c0_6, %c0_7] : memref<1x16x128xf32, #tpu.memory_space<vmem>>, vector<1x16x128xf32>
    %6 = vector.shape_cast %5 : vector<1x16x128xf32> to vector<16x128xf32>
    %7 = vector.shape_cast %4 : vector<16x128xf32> to vector<1x16x128xf32>
    tpu.vector_store %arg4[%c0_5, %c0_6, %c0_7], %7 {strides = array<i32>} : memref<1x16x128xf32, #tpu.memory_space<vmem>>, vector<1x16x128xf32>,
    return
  }
  func.func @transform_0(%arg0: i32, %arg1: i32) -> (i32, i32, i32) {
    %c0_i32 = arith.constant 0 : i32
    %c0_i32_0 = arith.constant 0 : i32
    return %arg0, %arg1, %c0_i32 : i32, i32, i32
  }
  func.func @transform_1(%arg0: i32, %arg1: i32) -> (i32, i32, i32) {
    %c0_i32 = arith.constant 0 : i32
    %c0_i32_0 = arith.constant 0 : i32
    %c0_i32_1 = arith.constant 0 : i32
    return %arg0, %c0_i32, %c0_i32_0 : i32, i32, i32
  }
  func.func @transform_2(%arg0: i32, %arg1: i32) -> (i32, i32, i32) {
    %c0_i32 = arith.constant 0 : i32
    %c0_i32_0 = arith.constant 0 : i32
    return %arg0, %arg1, %c0_i32 : i32, i32, i32
  }
}

</mosaic_0001>

<bundles_post_ra>
// kernel: tpu_custom_call.1
= control target key start
LH: loop header
LB: loop body
LE: loop exit
PB: predicated region body
PF: predicated region fallthrough
CT: control target
= control target key end

     0   :  { %7 = vsyncpa [#allocation3], 0  ;;  %s952_s0 = inlined_call_operand.hbm [shape: f32[2,16,16], index: 0, kind: input, shape index: {}]   ;;  %s953_s1 = inlined_call_operand.hbm [shape: f32[2,16,128], index: 1, kind: input, shape index: {}]   ;;  %s954_s2 = inlined_call_operand.hbm [shape: f32[2,16,128], index: 2, kind: output, shape index: {}]  }
   0x1   :  { %9 = vsyncpa [#allocation3 + $0x1], 0 }
   0x2   :  { %10 = vsyncpa [#allocation6], 0 }
   0x3   :  { %12 = vsyncpa [#allocation6 + $0x1], 0 }
   0x4   :  { %13 = vsyncpa [#allocation4], 0 }
   0x5   :  { %15 = vsyncpa [#allocation4 + $0x1], 0  ;;  %s716_s9 = smov 0   ;;  %s718_s10 = smov 0  }
   0x6   :  { %s720_s11 = smov 0   ;;  %s722_s12 = smov 0  }
   0x7   :  { %s724_s13 = smov 0   ;;  %s726_s14 = smov 0  }
   0x8 LB: > { %s436_s15 = sadd.s32 4294967295, %s692_s14   ;;  %s437_s16 = sadd.s32 4294967294, %s692_s14   ;;  %s692_s14 = sphi %s726_s14, %s21_s14   ;;  %s688_s13 = sphi %s724_s13, %s972_s13   ;;  %s684_s12 = sphi %s722_s12, %s971_s12   ;;  %s680_s11 = sphi %s720_s11, %s970_s11   ;;  %s676_s10 = sphi %s718_s10, %s969_s10   ;;  %s672_s9 = sphi %s716_s9, %s968_s9  }
   0x9   : > { %s33_s17 = sadd.s32 1, %s688_s13  ;;  %s42_s18 = sadd.s32 1, %s680_s11 }
   0xa   : > { %p35_p0 = scmp.ge.s32.totalorder %s33_s17, 2  ;;  %p49_p1 = scmp.ne.s32.totalorder %s680_s11, %s676_s10 }
   0xb   : > { %p50_p2 = scmp.eq.s32.totalorder %s692_s14, 0  ;;  %p55_p3 = scmp.ne.s32.totalorder %s676_s10, %s672_s9 }
   0xc   : > { %s974_s17 = smov (%p35_p0, %s33_s17), 0  ;;  %p56_p5 = scmp.eq.s32.totalorder %s436_s15, 0 }
   0xd   : > { %p757_p4 = por %p50_p2, %p49_p1  ;;  %s37_s20 = ssub.s32 %s688_s13, %s974_s17 }
   0xe   : > { %p107_p6 = scmp.eq.s32.totalorder %s436_s15, 1  ;;  %p40_p7 = scmp.eq.s32.totalorder %s37_s20, 0 }
   0xf   : > { %p763_p8 = por %p56_p5, %p55_p3  ;;  %p113_p10 = scmp.eq.s32.totalorder %s437_s16, 1 }
  0x10   : > { %p767_p9 = por %p107_p6, %p49_p1  ;;  %p492_p13 = scmp.lt.s32.totalorder %s692_s14, 2 }
  0x11   : > { %s958_s21 = scalar_select %p763_p8, 1, 0 }
  0x12   : > { %s959_s22 = scalar_select %p767_p9, 1, 0 }
  0x13   : > { %s772_s23 = scalar_select %p40_p7, %s680_s11, %s42_s18  }
  0x14   : > { %p774_p11 = por %p113_p10, %p55_p3  ;;  %s781_s25 = sand.u32 1, %s680_s11  }
  0x15   : > { %s440_s26 = sshll.u32 %s781_s25, 4  ;;  %s457_s27 = sshll.u32 %s688_s13, 8 }
  0x16   : > { %s960_s24 = scalar_select %p774_p11, 1, 0 }
  0x17   : > { %s790_s30 = scalar_lea.hbm %s952_s0, %s457_s27  ;;  %s137_s3 = scalar_lea.vmem [#allocation2], %s440_s26 }
  0x18   : > { %s146_s4 = sshll.u32 %s137_s3, 4  ;;  %p798_p0 = pnand %p492_p13, %p757_p4  ;;  %s794_s4 = int_to_ptr.vmem [resolvable:$true] %s146_s4 }
  0x19   : > { %s134_s6 = scalar_lea.sflag [#allocation3], %s781_s25  ;;  %s546_s7 = scalar_lea.hbm %s790_s30, 256 }
  0x1a   : > { %p547_p2 = scmp.ne.s32.totalorder %s790_s30, %s546_s7  ;;  %p548_p3 = pneg %p798_p0 }
  0x1b   : > { %s551_s16 = scalar_lea.hbm %s952_s0, 512  ;;  %p552_p4 = scmp.lt.u32.totalorder %s790_s30, %s952_s0 }
  0x1c   : > { %p549_p5 = pnand %p548_p3, %p547_p2  ;;  %p553_p7 = scmp.lt.u32.totalorder %s551_s16, %s546_s7 }
  0x1d   : > { %p555_p13 = scmp.lt.u32.totalorder %s546_s7, %s790_s30 }
  0x1e   : > { %p550_p6 = pneg %p549_p5  ;;  %p554_p10 = por %p553_p7, %p552_p4 }
  0x20   : > { %p556_p12 = por %p555_p13, %p554_p10 }
  0x22   : > { %p557_p1 = pnand %p556_p12, %p550_p6 }
  0x24   : > { %560 = shalt.err (!%p557_p1)
}
  0x25   : > { %s561_s20 = scalar_lea.vmem %s794_s4, 256  ;;  %s694_s28 = smov [#allocation2]  }
  0x26   : > { %p562_p2 = scmp.ne.s32.totalorder %s794_s4, %s561_s20  ;;  %s566_s29 = sshll.u32 %s694_s28, 4  ;;  %s567_s29 = int_to_ptr.vmem [resolvable:$false] %s566_s29 }
  0x27   : > { %s568_s3 = scalar_lea.vmem %s567_s29, 512  ;;  %p569_p9 = scmp.lt.s32.totalorder %s794_s4, %s567_s29 }
  0x28   : > { %p564_p5 = pnand %p562_p2, %p548_p3  ;;  %p570_p4 = scmp.lt.s32.totalorder %s568_s3, %s561_s20 }
  0x2a   : > { %p565_p11 = pneg %p564_p5  ;;  %p571_p7 = por %p570_p4, %p569_p9 }
  0x2c   : > { %p572_p10 = pnand %p571_p7, %p565_p11 }
  0x2e   : > { %575 = shalt.err (!%p572_p10)
}
  0x2f   : > { %s695_s7 = smov 128   ;;  %s696_s8 = smov 8  }
  0x30   : > { %484 = dma.hbm_to_vmem [thread:$0]  (!%p798_p0), %s790_s30, 256, %s794_s4, %s134_s6, %s695_s7, %s695_s7, %s696_s8  }
  0x31   : > { %p175_p9 = scmp.lt.s32.totalorder %s692_s14, 3  ;;  %s840_s18 = scalar_lea.hbm %s953_s1, %s457_s27 }
  0x32   : > { %p962_p11 = scmp.ge.s32.totalorder %s692_s14, 1  ;;  %s160_s20 = scalar_lea.vmem [#allocation5], %s440_s26 }
  0x33   : > { %s167_s28 = sshll.u32 %s160_s20, 4  ;;  %s157_s30 = scalar_lea.sflag [#allocation6], %s781_s25  ;;  %s850_s28 = int_to_ptr.vmem [resolvable:$true] %s167_s28 }
  0x34   : > { %p844_p12 = pnand %p962_p11, %p175_p9  ;;  %s576_s4 = scalar_lea.hbm %s840_s18, 256 }
  0x35   : > { %p577_p1 = scmp.ne.s32.totalorder %s840_s18, %s576_s4  ;;  %s581_s29 = scalar_lea.hbm %s953_s1, 512 }
  0x36   : > { %p582_p2 = scmp.lt.u32.totalorder %s840_s18, %s953_s1  ;;  %p583_p5 = scmp.lt.u32.totalorder %s581_s29, %s576_s4 }
  0x37   : > { %p579_p6 = pnand %p577_p1, %p548_p3  ;;  %p585_p7 = scmp.lt.u32.totalorder %s576_s4, %s840_s18 }
  0x38   : > { %p584_p4 = por %p583_p5, %p582_p2 }
  0x39   : > { %p580_p13 = pneg %p579_p6 }
  0x3a   : > { %p586_p10 = por %p585_p7, %p584_p4 }
  0x3c   : > { %p587_p9 = pnand %p586_p10, %p580_p13 }
  0x3e   : > { %590 = shalt.err (!%p587_p9)
}
  0x3f   : > { %s591_s26 = scalar_lea.vmem %s850_s28, 256  ;;  %s697_s16 = smov [#allocation5]  }
  0x40   : > { %p592_p11 = scmp.ne.s32.totalorder %s850_s28, %s591_s26  ;;  %s596_s20 = sshll.u32 %s697_s16, 4  ;;  %s597_s20 = int_to_ptr.vmem [resolvable:$false] %s596_s20 }
  0x41   : > { %s598_s27 = scalar_lea.vmem %s597_s20, 512  ;;  %p599_p8 = scmp.lt.s32.totalorder %s850_s28, %s597_s20 }
  0x42   : > { %p594_p1 = pnand %p592_p11, %p548_p3  ;;  %p600_p2 = scmp.lt.s32.totalorder %s598_s27, %s591_s26 }
  0x44   : > { %p595_p6 = pneg %p594_p1  ;;  %p601_p5 = por %p600_p2, %p599_p8 }
  0x46   : > { %p602_p4 = pnand %p601_p5, %p595_p6 }
  0x48   : > { %605 = shalt.err (!%p602_p4)
}
  0x49   : > { %487 = dma.hbm_to_vmem [thread:$0]  (!%p798_p0), %s840_s18, 256, %s850_s28, %s157_s30, %s695_s7, %s695_s7, %s696_s8  }
  0x4a   : > { %179 = sbr.rel (%p844_p12) target bundleno = 319 (0x13f), region = 28  ;;  %s884_s4 = sand.u32 (!%p844_p12), 1, %s676_s10  }
  0x4b   : > { %s447_s6 = sshll.u32 (!%p844_p12), %s884_s4, 4  ;;  %s182_s29 = scalar_lea.sflag (!%p844_p12), [#allocation3], %s884_s4 }
  0x4c   : > { %s185_s5 = scalar_lea.vmem (!%p844_p12), [#allocation2], %s447_s6  ;;  %p964_p8 = scmp.ne.s32.totalorder (!%p844_p12), %s958_s21, 0 }
  0x51   : > { %659 = dma.done.wait (%p964_p8), %s182_s29, 256  }
  0x52   : > { %661 = vsyncadd (%p964_p8), %s182_s29, 4294967040  ;;  %s191_s25 = scalar_lea.sflag [#allocation6], %s884_s4  ;;  %s194_s7 = scalar_lea.vmem [#allocation5], %s447_s6 }
  0x53   : > { %663 = dma.done.wait (%p964_p8), %s191_s25, 256  }
  0x54   : > { %665 = vsyncadd (%p964_p8), %s191_s25, 4294967040  ;;  %vm226_vm0 = vcmask 130048   ;;  %v224_v0 = vld [vmem:[%s194_s7] sm:$0xff]  ;;  %v225_v1 = vld [vmem:[%s194_s7 + $0x8] sm:$0xff]  ;;  %s219_s8 = scalar_lea.vmem [#allocation7], %s447_s6  ;;  %s459_s19 = sshll.u32 %s684_s12, 8 }
  0x55   : > { %v222_v2 = vld [vmem:[%s185_s5] sm:$0xff]  ;;  %v471_v3 = vpack.c.bf16 %v225_v1, %v224_v0  ;;  %v223_v4 = vld [vmem:[%s185_s5 + $0x8] sm:$0xff]  ;;  %s326_s18 = sshll.u32 %s219_s8, 4  ;;  %s903_s30 = scalar_lea.hbm %s954_s2, %s459_s19  ;;  %s898_s18 = int_to_ptr.vmem [resolvable:$true] %s326_s18 }
  0x56   : > { %468 = vmatprep.mubr.msk.f32.mxu0 %vm226_vm0, %v222_v2  ;;  %s311_s3 = scalar_lea.sflag [#allocation4], %s884_s4  ;;  %s606_s15 = scalar_lea.vmem %s898_s18, 256 }
  0x57   : > { %472 = vmatprep.subr.bf16.mxu0 %v471_v3  ;;  %p607_p0 = scmp.ne.s32.totalorder %s898_s18, %s606_s15  ;;  %p965_p3 = scmp.ne.s32.totalorder %s959_s22, 0 }
  0x58   : > { %474 = vmatpush3.bf16.msra.mxu0 %v471_v3  ;;  %s698_s12 = smov [#allocation7]  }
  0x59   : > { %p608_p12 = pnand %p607_p0, %p965_p3  ;;  %s610_s26 = sshll.u32 %s698_s12, 4  ;;  %s611_s26 = int_to_ptr.vmem [resolvable:$false] %s610_s26 }
  0x5a   : > { %s612_s16 = scalar_lea.vmem %s611_s26, 512  ;;  %p613_p7 = scmp.lt.s32.totalorder %s898_s18, %s611_s26 }
  0x5b   : > { %469 = vmatmul.mubr.msk.f32.vlgmr.msra.gmra.mrb[0].mxu0 %vm226_vm0, %v223_v4  ;;  %p609_p13 = pneg %p608_p12  ;;  %p614_p10 = scmp.lt.s32.totalorder %s612_s16, %s606_s15 }
  0x5d   : > { %p615_p9 = por %p614_p10, %p613_p7 }
  0x5f   : > { %p616_p11 = pnand %p615_p9, %p609_p13 }
 0x12e   : > { %v470_v5 = vpop.f32.mrb[0].mxu0 }
 0x12f   : > { %309 = vst [vmem:[%s219_s8 + $0x8] sm:$0xff] %v470_v5  ;;  %v299_v6 = vpop.f32.mrb[1].mxu0 }
 0x130   : > { %308 = vst [vmem:[%s219_s8] sm:$0xff] %v299_v6 }
 0x131   : > { %619 = shalt.err (!%p616_p11)
}
 0x132   : > { %s620_s20 = scalar_lea.hbm %s903_s30, 256  ;;  %s624_s29 = scalar_lea.hbm %s954_s2, 512 }
 0x133   : > { %p621_p1 = scmp.ne.s32.totalorder %s903_s30, %s620_s20  ;;  %p625_p5 = scmp.lt.u32.totalorder %s903_s30, %s954_s2 }
 0x134   : > { %p626_p4 = scmp.lt.u32.totalorder %s624_s29, %s620_s20  ;;  %p628_p0 = scmp.lt.u32.totalorder %s620_s20, %s903_s30 }
 0x135   : > { %p622_p6 = pnand %p621_p1, %p965_p3 }
 0x136   : > { %p627_p8 = por %p626_p4, %p625_p5 }
 0x137   : > { %p623_p2 = pneg %p622_p6 }
 0x138   : > { %p629_p12 = por %p628_p0, %p627_p8 }
 0x13a   : > { %p630_p13 = pnand %p629_p12, %p623_p2 }
 0x13c   : > { %633 = shalt.err (!%p630_p13)
}
 0x13d   : > { %s699_s7 = smov 128   ;;  %s700_s8 = smov 8  }
 0x13e   : > { %479 = dma.vmem_to_hbm [thread:$0]  (%p965_p3), %s898_s18, 256, %s903_s30, %s311_s3, %s699_s7, %s699_s7, %s700_s8  }
 0x13f PF: > { %s341_s19 = sand.u32 1, %s672_s9   ;;  %p966_p7 = scmp.ne.s32.totalorder %s960_s24, 0 }
 0x140   : > { %p967_p10 = scmp.ge.s32.totalorder %s692_s14, 2  ;;  %s342_s21 = scalar_lea.sflag [#allocation4], %s341_s19 }
 0x142   : > { %p489_p9 = pnand %p967_p10, %p966_p7 }
 0x144   : > { %667 = dma.done.wait (!%p489_p9), %s342_s21, 256  }
 0x145   : > { %669 = vsyncadd (!%p489_p9), %s342_s21, 4294967040  ;;  %s21_s14 = sadd.s32 1, %s692_s14   ;;  %s968_s9 = smov %s676_s10 }
 0x146   : > { %p18_p11 = scmp.ge.s32.totalorder %s21_s14, 4   ;;  %s969_s10 = smov %s680_s11 }
 0x147   : > { %s970_s11 = smov %s772_s23  ;;  %s971_s12 = smov %s688_s13 }
 0x148   : > { %s972_s13 = smov %s974_s17  ;;  %20 = sbr.rel (!%p18_p11) target bundleno = 8 (0x8), region = 86 }
 0x14f   :  { %347 = vsyncpa [#allocation3], 1 }
 0x150   :  { %349 = vsyncpa [#allocation3 + $0x1], 1 }
 0x151   :  { %350 = vsyncpa [#allocation6], 1 }
 0x152   :  { %352 = vsyncpa [#allocation6 + $0x1], 1 }
 0x153   :  { %353 = vsyncpa [#allocation4], 1 }
 0x154   :  { %355 = vsyncpa [#allocation4 + $0x1], 1 }

</bundles_post_ra>
